<compile_context>
chip_gen: v5e
topology: v5e:2x2
jax: 0.10.0
libtpu: 0.0.40
codegen_flags: <defaults>
</compile_context>

<pallas_src>
import math
import jax
import jax.numpy as jnp
from jax import lax
from jax.experimental import pallas as pl
from jax.experimental.pallas import tpu as pltpu

# ---- model hyper-parameters (small, consistent with the module) ----
B = 2          # batch
S = 8          # sequence length
H = 32         # num_hiddens
NUM_HEADS = 4
DH = H // NUM_HEADS
FFN_H = 64     # ffn_num_hiddens
EPS = 1e-5
BS = B * S


def _layer_norm(x, gamma, beta):
    # x: (BS, H), gamma/beta: (1, H); biased variance like torch.nn.LayerNorm
    mean = jnp.mean(x, axis=-1, keepdims=True)
    var = jnp.mean((x - mean) ** 2, axis=-1, keepdims=True)
    return gamma * (x - mean) * lax.rsqrt(var + EPS) + beta


def encoder_kernel(vl_ref, x_ref, wqkv_ref, wo_ref, w1_ref, w2_ref, vecs_ref,
                   out_ref):
    # ---- unpack the packed small parameters (single vreg tile, static slices) ----
    vecs = vecs_ref[...]                     # (6, FFN_H)
    g1 = vecs[0:1, 0:H]
    be1 = vecs[1:2, 0:H]
    bf1 = vecs[2:3, :]                       # (1, FFN_H)
    bf2 = vecs[3:4, 0:H]
    g2 = vecs[4:5, 0:H]
    be2 = vecs[5:6, 0:H]

    # ---- fused QKV projection on the flattened batch (B*S, H) ----
    xf = x_ref[...].reshape(BS, H).astype(jnp.float32)                   # (16, 32)
    qkv = jnp.dot(xf, wqkv_ref[...], preferred_element_type=jnp.float32)  # (16, 96)
    qkv3 = qkv.reshape(B, S, 3 * H)                                       # (2, 8, 96)
    q3 = qkv3[:, :, 0:H]        # already scaled by 1/sqrt(DH) via the wrapper
    k3 = qkv3[:, :, H:2 * H]
    v3 = qkv3[:, :, 2 * H:3 * H]

    # ---- valid-length key mask, (B, 1, S), broadcast over queries ----
    key_ids = lax.broadcasted_iota(jnp.int32, (B, 1, S), 2)
    mask = key_ids < vl_ref[...]                                          # (B, 1, S)

    # ---- multi-head attention; head outputs fold straight into the O-proj ----
    attn_f = jnp.zeros((BS, H), jnp.float32)
    for h in range(NUM_HEADS):
        lo, hi = h * DH, (h + 1) * DH
        qh = q3[:, :, lo:hi]                                              # (B, S, DH)
        kh = k3[:, :, lo:hi]
        vh = v3[:, :, lo:hi]
        s = jnp.einsum('bqd,bkd->bqk', qh, kh,
                       preferred_element_type=jnp.float32)                # (B, S, S)
        s = jnp.where(mask, s, jnp.float32(-1e6))
        m = jnp.max(s, axis=-1, keepdims=True)
        e = jnp.exp(s - m)
        p = e * pl.reciprocal(jnp.sum(e, axis=-1, keepdims=True), approx=False)
        o = jnp.einsum('bqk,bkd->bqd', p, vh,
                       preferred_element_type=jnp.float32)                # (B, S, DH)
        attn_f = attn_f + jnp.dot(o.reshape(BS, DH), wo_ref[lo:hi, :],
                                  preferred_element_type=jnp.float32)     # (16, 32)

    # ---- AddNorm 1 (dropout = identity at inference) ----
    y = _layer_norm(attn_f + xf, g1, be1)                                 # (16, 32)

    # ---- PositionWiseFFN ----
    h1 = jnp.dot(y, w1_ref[...], preferred_element_type=jnp.float32) + bf1
    h1 = jnp.maximum(h1, 0.0)
    f = jnp.dot(h1, w2_ref[...], preferred_element_type=jnp.float32) + bf2

    # ---- AddNorm 2 ----
    z = _layer_norm(f + y, g2, be2)
    out_ref[...] = z.reshape(B, S, H).astype(out_ref.dtype)


def transformer_encoder_level(x, valid_lens, params):
    (wq, wk, wv, wo, g1, be1, w1, bf1, w2, bf2, g2, be2) = params

    # Fold the 1/sqrt(DH) attention scale into W_q and pack QKV weights.
    scale = 1.0 / math.sqrt(DH)
    wqkv = jnp.concatenate([wq * scale, wk, wv], axis=1)                  # (H, 3H)

    # Pack the six small vectors into one (6, FFN_H) slab (zero-padded rows).
    def pad_lanes(v):
        return jnp.pad(v, ((0, 0), (0, FFN_H - v.shape[1])))
    vecs = jnp.concatenate(
        [pad_lanes(g1), pad_lanes(be1), bf1,
         pad_lanes(bf2), pad_lanes(g2), pad_lanes(be2)], axis=0)          # (6, FFN_H)

    vl3 = valid_lens.astype(jnp.int32).reshape(B, 1, 1)

    vmem = pl.BlockSpec(memory_space=pltpu.MemorySpace.VMEM)
    return pl.pallas_call(
        encoder_kernel,
        out_shape=jax.ShapeDtypeStruct((B, S, H), jnp.float32),
        in_specs=[vmem] * 7,          # whole arrays in VMEM, single program
        out_specs=vmem,
    )(vl3, x, wqkv, wo, w1, w2, vecs)


def reference(x, valid_lens, params):
    """Pure-JAX reference matching d2l MultiHeadAttention + AddNorm + FFN."""
    (wq, wk, wv, wo, g1, be1, w1, bf1, w2, bf2, g2, be2) = params

    def ln(t, gamma, beta):
        mean = jnp.mean(t, axis=-1, keepdims=True)
        var = jnp.mean((t - mean) ** 2, axis=-1, keepdims=True)
        return gamma * (t - mean) / jnp.sqrt(var + EPS) + beta

    q = x @ wq
    k = x @ wk
    v = x @ wv

    def split(t):
        return t.reshape(B, S, NUM_HEADS, DH).transpose(0, 2, 1, 3)
    qh, kh, vh = split(q), split(k), split(v)
    scores = jnp.einsum('bhqd,bhkd->bhqk', qh, kh) / math.sqrt(DH)
    key_ids = jnp.arange(S)[None, None, None, :]
    mask = key_ids < valid_lens[:, None, None, None]
    scores = jnp.where(mask, scores, -1e6)
    p = jax.nn.softmax(scores, axis=-1)
    o = jnp.einsum('bhqk,bhkd->bhqd', p, vh)
    o = o.transpose(0, 2, 1, 3).reshape(B, S, H) @ wo
    y = ln(o + x, g1, be1)
    f = jnp.maximum(y @ w1 + bf1, 0.0) @ w2 + bf2
    return ln(f + y, g2, be2)


if __name__ == "__main__":
    key = jax.random.PRNGKey(0)
    keys = jax.random.split(key, 8)

    x = jax.random.normal(keys[0], (B, S, H), dtype=jnp.float32)
    valid_lens = jnp.array([5, 8], dtype=jnp.int32)

    scale = 0.1
    wq = scale * jax.random.normal(keys[1], (H, H), dtype=jnp.float32)
    wk = scale * jax.random.normal(keys[2], (H, H), dtype=jnp.float32)
    wv = scale * jax.random.normal(keys[3], (H, H), dtype=jnp.float32)
    wo = scale * jax.random.normal(keys[4], (H, H), dtype=jnp.float32)
    g1 = jnp.ones((1, H), dtype=jnp.float32)
    be1 = jnp.zeros((1, H), dtype=jnp.float32)
    w1 = scale * jax.random.normal(keys[5], (H, FFN_H), dtype=jnp.float32)
    bf1 = 0.01 * jnp.ones((1, FFN_H), dtype=jnp.float32)
    w2 = scale * jax.random.normal(keys[6], (FFN_H, H), dtype=jnp.float32)
    bf2 = 0.01 * jnp.ones((1, H), dtype=jnp.float32)
    g2 = jnp.ones((1, H), dtype=jnp.float32)
    be2 = jnp.zeros((1, H), dtype=jnp.float32)

    params = (wq, wk, wv, wo, g1, be1, w1, bf1, w2, bf2, g2, be2)

    out = transformer_encoder_level(x, valid_lens, params)
    out = jax.block_until_ready(out)

    ref = reference(x, valid_lens, params)
    assert out.shape == (B, S, H)
    assert jnp.allclose(out, ref, atol=1e-4, rtol=1e-4), \
        f"max err {jnp.max(jnp.abs(out - ref))}"
    print("KERNEL_OK")
</pallas_src>

<mosaic_0001>
module attributes {stable_mosaic.version = 11 : i64} {
  func.func @encoder_kernel(%arg0: memref<2x1x1xi32, #tpu.memory_space<vmem>>, %arg1: memref<2x8x32xf32, #tpu.memory_space<vmem>>, %arg2: memref<32x96xf32, #tpu.memory_space<vmem>>, %arg3: memref<32x32xf32, #tpu.memory_space<vmem>>, %arg4: memref<32x64xf32, #tpu.memory_space<vmem>>, %arg5: memref<64x32xf32, #tpu.memory_space<vmem>>, %arg6: memref<6x64xf32, #tpu.memory_space<vmem>>, %arg7: memref<2x8x32xf32, #tpu.memory_space<vmem>>) attributes {dimension_semantics = [], scalar_prefetch = 0 : i64, scratch_operands = 0 : i64, tpu.core_type = #tpu.core_type<tc>} {
    %c0 = arith.constant 0 : index
    %c0_0 = arith.constant 0 : index
    %0 = vector.load %arg6[%c0, %c0_0] : memref<6x64xf32, #tpu.memory_space<vmem>>, vector<6x64xf32>
    %1 = vector.extract_strided_slice %0 {offsets = [0, 0], sizes = [1, 32], strides = [1, 1]} : vector<6x64xf32> to vector<1x32xf32>
    %2 = vector.extract_strided_slice %0 {offsets = [1, 0], sizes = [1, 32], strides = [1, 1]} : vector<6x64xf32> to vector<1x32xf32>
    %3 = vector.extract_strided_slice %0 {offsets = [2, 0], sizes = [1, 64], strides = [1, 1]} : vector<6x64xf32> to vector<1x64xf32>
    %4 = vector.extract_strided_slice %0 {offsets = [3, 0], sizes = [1, 32], strides = [1, 1]} : vector<6x64xf32> to vector<1x32xf32>
    %5 = vector.extract_strided_slice %0 {offsets = [4, 0], sizes = [1, 32], strides = [1, 1]} : vector<6x64xf32> to vector<1x32xf32>
    %6 = vector.extract_strided_slice %0 {offsets = [5, 0], sizes = [1, 32], strides = [1, 1]} : vector<6x64xf32> to vector<1x32xf32>
    %c0_1 = arith.constant 0 : index
    %c0_2 = arith.constant 0 : index
    %c0_3 = arith.constant 0 : index
    %7 = vector.load %arg1[%c0_1, %c0_2, %c0_3] : memref<2x8x32xf32, #tpu.memory_space<vmem>>, vector<2x8x32xf32>
    %8 = vector.shape_cast %7 : vector<2x8x32xf32> to vector<16x32xf32>
    %c0_4 = arith.constant 0 : index
    %c0_5 = arith.constant 0 : index
    %9 = vector.load %arg2[%c0_4, %c0_5] : memref<32x96xf32, #tpu.memory_space<vmem>>, vector<32x96xf32>
    %cst = arith.constant dense<0.000000e+00> : vector<16x96xf32>
    %10 = tpu.matmul %8, %9, %cst {dimension_numbers = #tpu.dot_dimension_numbers<[1], [0], [0], [1], [0, 0, 1, 1], [], []>} : vector<16x32xf32>, vector<32x96xf32>, vector<16x96xf32> -> vector<16x96xf32>
    %11 = vector.shape_cast %10 : vector<16x96xf32> to vector<2x8x96xf32>
    %12 = vector.extract_strided_slice %11 {offsets = [0, 0, 0], sizes = [2, 8, 32], strides = [1, 1, 1]} : vector<2x8x96xf32> to vector<2x8x32xf32>
    %13 = vector.extract_strided_slice %11 {offsets = [0, 0, 32], sizes = [2, 8, 32], strides = [1, 1, 1]} : vector<2x8x96xf32> to vector<2x8x32xf32>
    %14 = vector.extract_strided_slice %11 {offsets = [0, 0, 64], sizes = [2, 8, 32], strides = [1, 1, 1]} : vector<2x8x96xf32> to vector<2x8x32xf32>
    %15 = tpu.iota {dimensions = array<i32: 2>} : vector<2x1x8xi32>
    %c0_6 = arith.constant 0 : index
    %c0_7 = arith.constant 0 : index
    %c0_8 = arith.constant 0 : index
    %16 = vector.load %arg0[%c0_6, %c0_7, %c0_8] : memref<2x1x1xi32, #tpu.memory_space<vmem>>, vector<2x1x1xi32>
    %17 = vector.broadcast %16 : vector<2x1x1xi32> to vector<2x1x8xi32>
    %18 = arith.cmpi slt, %15, %17 : vector<2x1x8xi32>
    %cst_9 = arith.constant 0.000000e+00 : f32
    %19 = vector.broadcast %cst_9 : f32 to vector<16x32xf32>
    %20 = vector.extract_strided_slice %12 {offsets = [0, 0, 0], sizes = [2, 8, 8], strides = [1, 1, 1]} : vector<2x8x32xf32> to vector<2x8x8xf32>
    %21 = vector.extract_strided_slice %13 {offsets = [0, 0, 0], sizes = [2, 8, 8], strides = [1, 1, 1]} : vector<2x8x32xf32> to vector<2x8x8xf32>
    %22 = vector.extract_strided_slice %14 {offsets = [0, 0, 0], sizes = [2, 8, 8], strides = [1, 1, 1]} : vector<2x8x32xf32> to vector<2x8x8xf32>
    "tpu.trace_start"() <{level = 10 : i32, message = "bqd,bkd->bqk"}> : () -> ()
    %cst_10 = arith.constant dense<0.000000e+00> : vector<2x8x8xf32>
    %23 = tpu.matmul %20, %21, %cst_10 {dimension_numbers = #tpu.dot_dimension_numbers<[2], [2], [1], [1], [0, 0, 0, 1, 1, 1], [0], [0]>} : vector<2x8x8xf32>, vector<2x8x8xf32>, vector<2x8x8xf32> -> vector<2x8x8xf32>
    %cst_11 = arith.constant -1.000000e+06 : f32
    "tpu.trace_stop"() : () -> ()
    %24 = vector.shape_cast %18 : vector<2x1x8xi1> to vector<2x1x8xi1>
    %25 = vector.broadcast %24 : vector<2x1x8xi1> to vector<2x8x8xi1>
    %26 = vector.broadcast %cst_11 : f32 to vector<2x8x8xf32>
    %27 = arith.select %25, %23, %26 : vector<2x8x8xi1>, vector<2x8x8xf32>
    %cst_12 = arith.constant dense<0xFF800000> : vector<2x8xf32>
    %28 = vector.multi_reduction <maximumf>, %27, %cst_12 [2] : vector<2x8x8xf32> to vector<2x8xf32>
    %29 = vector.shape_cast %28 : vector<2x8xf32> to vector<2x8x1xf32>
    %30 = vector.broadcast %29 : vector<2x8x1xf32> to vector<2x8x8xf32>
    %31 = arith.subf %27, %30 : vector<2x8x8xf32>
    %32 = math.exp %31 : vector<2x8x8xf32>
    %cst_13 = arith.constant dense<0.000000e+00> : vector<2x8xf32>
    %33 = vector.multi_reduction <add>, %32, %cst_13 [2] : vector<2x8x8xf32> to vector<2x8xf32>
    %34 = vector.shape_cast %33 : vector<2x8xf32> to vector<2x8x1xf32>
    %35 = tpu.reciprocal %34 : vector<2x8x1xf32> -> vector<2x8x1xf32>
    %36 = vector.broadcast %35 : vector<2x8x1xf32> to vector<2x8x8xf32>
    %37 = arith.mulf %32, %36 : vector<2x8x8xf32>
    "tpu.trace_start"() <{level = 10 : i32, message = "bqk,bkd->bqd"}> : () -> ()
    %cst_14 = arith.constant dense<0.000000e+00> : vector<2x8x8xf32>
    %38 = tpu.matmul %37, %22, %cst_14 {dimension_numbers = #tpu.dot_dimension_numbers<[2], [1], [1], [2], [0, 0, 0, 1, 1, 2], [0], [0]>} : vector<2x8x8xf32>, vector<2x8x8xf32>, vector<2x8x8xf32> -> vector<2x8x8xf32>
    "tpu.trace_stop"() : () -> ()
    %39 = vector.shape_cast %38 : vector<2x8x8xf32> to vector<16x8xf32>
    %c0_15 = arith.constant 0 : index
    %c0_16 = arith.constant 0 : index
    %40 = vector.load %arg3[%c0_15, %c0_16] : memref<32x32xf32, #tpu.memory_space<vmem>>, vector<8x32xf32>
    %cst_17 = arith.constant dense<0.000000e+00> : vector<16x32xf32>
    %41 = tpu.matmul %39, %40, %cst_17 {dimension_numbers = #tpu.dot_dimension_numbers<[1], [0], [0], [1], [0, 0, 1, 1], [], []>} : vector<16x8xf32>, vector<8x32xf32>, vector<16x32xf32> -> vector<16x32xf32>
    %42 = arith.addf %19, %41 : vector<16x32xf32>
    %43 = vector.extract_strided_slice %12 {offsets = [0, 0, 8], sizes = [2, 8, 8], strides = [1, 1, 1]} : vector<2x8x32xf32> to vector<2x8x8xf32>
    %44 = vector.extract_strided_slice %13 {offsets = [0, 0, 8], sizes = [2, 8, 8], strides = [1, 1, 1]} : vector<2x8x32xf32> to vector<2x8x8xf32>
    %45 = vector.extract_strided_slice %14 {offsets = [0, 0, 8], sizes = [2, 8, 8], strides = [1, 1, 1]} : vector<2x8x32xf32> to vector<2x8x8xf32>
    "tpu.trace_start"() <{level = 10 : i32, message = "bqd,bkd->bqk"}> : () -> ()
    %cst_18 = arith.constant dense<0.000000e+00> : vector<2x8x8xf32>
    %46 = tpu.matmul %43, %44, %cst_18 {dimension_numbers = #tpu.dot_dimension_numbers<[2], [2], [1], [1], [0, 0, 0, 1, 1, 1], [0], [0]>} : vector<2x8x8xf32>, vector<2x8x8xf32>, vector<2x8x8xf32> -> vector<2x8x8xf32>
    %cst_19 = arith.constant -1.000000e+06 : f32
    "tpu.trace_stop"() : () -> ()
    %47 = vector.shape_cast %18 : vector<2x1x8xi1> to vector<2x1x8xi1>
    %48 = vector.broadcast %47 : vector<2x1x8xi1> to vector<2x8x8xi1>
    %49 = vector.broadcast %cst_19 : f32 to vector<2x8x8xf32>
    %50 = arith.select %48, %46, %49 : vector<2x8x8xi1>, vector<2x8x8xf32>
    %cst_20 = arith.constant dense<0xFF800000> : vector<2x8xf32>
    %51 = vector.multi_reduction <maximumf>, %50, %cst_20 [2] : vector<2x8x8xf32> to vector<2x8xf32>
    %52 = vector.shape_cast %51 : vector<2x8xf32> to vector<2x8x1xf32>
    %53 = vector.broadcast %52 : vector<2x8x1xf32> to vector<2x8x8xf32>
    %54 = arith.subf %50, %53 : vector<2x8x8xf32>
    %55 = math.exp %54 : vector<2x8x8xf32>
    %cst_21 = arith.constant dense<0.000000e+00> : vector<2x8xf32>
    %56 = vector.multi_reduction <add>, %55, %cst_21 [2] : vector<2x8x8xf32> to vector<2x8xf32>
    %57 = vector.shape_cast %56 : vector<2x8xf32> to vector<2x8x1xf32>
    %58 = tpu.reciprocal %57 : vector<2x8x1xf32> -> vector<2x8x1xf32>
    %59 = vector.broadcast %58 : vector<2x8x1xf32> to vector<2x8x8xf32>
    %60 = arith.mulf %55, %59 : vector<2x8x8xf32>
    "tpu.trace_start"() <{level = 10 : i32, message = "bqk,bkd->bqd"}> : () -> ()
    %cst_22 = arith.constant dense<0.000000e+00> : vector<2x8x8xf32>
    %61 = tpu.matmul %60, %45, %cst_22 {dimension_numbers = #tpu.dot_dimension_numbers<[2], [1], [1], [2], [0, 0, 0, 1, 1, 2], [0], [0]>} : vector<2x8x8xf32>, vector<2x8x8xf32>, vector<2x8x8xf32> -> vector<2x8x8xf32>
    "tpu.trace_stop"() : () -> ()
    %62 = vector.shape_cast %61 : vector<2x8x8xf32> to vector<16x8xf32>
    %c8 = arith.constant 8 : index
    %c0_23 = arith.constant 0 : index
    %63 = vector.load %arg3[%c8, %c0_23] : memref<32x32xf32, #tpu.memory_space<vmem>>, vector<8x32xf32>
    %cst_24 = arith.constant dense<0.000000e+00> : vector<16x32xf32>
    %64 = tpu.matmul %62, %63, %cst_24 {dimension_numbers = #tpu.dot_dimension_numbers<[1], [0], [0], [1], [0, 0, 1, 1], [], []>} : vector<16x8xf32>, vector<8x32xf32>, vector<16x32xf32> -> vector<16x32xf32>
    %65 = arith.addf %42, %64 : vector<16x32xf32>
    %66 = vector.extract_strided_slice %12 {offsets = [0, 0, 16], sizes = [2, 8, 8], strides = [1, 1, 1]} : vector<2x8x32xf32> to vector<2x8x8xf32>
    %67 = vector.extract_strided_slice %13 {offsets = [0, 0, 16], sizes = [2, 8, 8], strides = [1, 1, 1]} : vector<2x8x32xf32> to vector<2x8x8xf32>
    %68 = vector.extract_strided_slice %14 {offsets = [0, 0, 16], sizes = [2, 8, 8], strides = [1, 1, 1]} : vector<2x8x32xf32> to vector<2x8x8xf32>
    "tpu.trace_start"() <{level = 10 : i32, message = "bqd,bkd->bqk"}> : () -> ()
    %cst_25 = arith.constant dense<0.000000e+00> : vector<2x8x8xf32>
    %69 = tpu.matmul %66, %67, %cst_25 {dimension_numbers = #tpu.dot_dimension_numbers<[2], [2], [1], [1], [0, 0, 0, 1, 1, 1], [0], [0]>} : vector<2x8x8xf32>, vector<2x8x8xf32>, vector<2x8x8xf32> -> vector<2x8x8xf32>
    %cst_26 = arith.constant -1.000000e+06 : f32
    "tpu.trace_stop"() : () -> ()
    %70 = vector.shape_cast %18 : vector<2x1x8xi1> to vector<2x1x8xi1>
    %71 = vector.broadcast %70 : vector<2x1x8xi1> to vector<2x8x8xi1>
    %72 = vector.broadcast %cst_26 : f32 to vector<2x8x8xf32>
    %73 = arith.select %71, %69, %72 : vector<2x8x8xi1>, vector<2x8x8xf32>
    %cst_27 = arith.constant dense<0xFF800000> : vector<2x8xf32>
    %74 = vector.multi_reduction <maximumf>, %73, %cst_27 [2] : vector<2x8x8xf32> to vector<2x8xf32>
    %75 = vector.shape_cast %74 : vector<2x8xf32> to vector<2x8x1xf32>
    %76 = vector.broadcast %75 : vector<2x8x1xf32> to vector<2x8x8xf32>
    %77 = arith.subf %73, %76 : vector<2x8x8xf32>
    %78 = math.exp %77 : vector<2x8x8xf32>
    %cst_28 = arith.constant dense<0.000000e+00> : vector<2x8xf32>
    %79 = vector.multi_reduction <add>, %78, %cst_28 [2] : vector<2x8x8xf32> to vector<2x8xf32>
    %80 = vector.shape_cast %79 : vector<2x8xf32> to vector<2x8x1xf32>
    %81 = tpu.reciprocal %80 : vector<2x8x1xf32> -> vector<2x8x1xf32>
    %82 = vector.broadcast %81 : vector<2x8x1xf32> to vector<2x8x8xf32>
    %83 = arith.mulf %78, %82 : vector<2x8x8xf32>
    "tpu.trace_start"() <{level = 10 : i32, message = "bqk,bkd->bqd"}> : () -> ()
    %cst_29 = arith.constant dense<0.000000e+00> : vector<2x8x8xf32>
    %84 = tpu.matmul %83, %68, %cst_29 {dimension_numbers = #tpu.dot_dimension_numbers<[2], [1], [1], [2], [0, 0, 0, 1, 1, 2], [0], [0]>} : vector<2x8x8xf32>, vector<2x8x8xf32>, vector<2x8x8xf32> -> vector<2x8x8xf32>
    "tpu.trace_stop"() : () -> ()
    %85 = vector.shape_cast %84 : vector<2x8x8xf32> to vector<16x8xf32>
    %c16 = arith.constant 16 : index
    %c0_30 = arith.constant 0 : index
    %86 = vector.load %arg3[%c16, %c0_30] : memref<32x32xf32, #tpu.memory_space<vmem>>, vector<8x32xf32>
    %cst_31 = arith.constant dense<0.000000e+00> : vector<16x32xf32>
    %87 = tpu.matmul %85, %86, %cst_31 {dimension_numbers = #tpu.dot_dimension_numbers<[1], [0], [0], [1], [0, 0, 1, 1], [], []>} : vector<16x8xf32>, vector<8x32xf32>, vector<16x32xf32> -> vector<16x32xf32>
    %88 = arith.addf %65, %87 : vector<16x32xf32>
    %89 = vector.extract_strided_slice %12 {offsets = [0, 0, 24], sizes = [2, 8, 8], strides = [1, 1, 1]} : vector<2x8x32xf32> to vector<2x8x8xf32>
    %90 = vector.extract_strided_slice %13 {offsets = [0, 0, 24], sizes = [2, 8, 8], strides = [1, 1, 1]} : vector<2x8x32xf32> to vector<2x8x8xf32>
    %91 = vector.extract_strided_slice %14 {offsets = [0, 0, 24], sizes = [2, 8, 8], strides = [1, 1, 1]} : vector<2x8x32xf32> to vector<2x8x8xf32>
    "tpu.trace_start"() <{level = 10 : i32, message = "bqd,bkd->bqk"}> : () -> ()
    %cst_32 = arith.constant dense<0.000000e+00> : vector<2x8x8xf32>
    %92 = tpu.matmul %89, %90, %cst_32 {dimension_numbers = #tpu.dot_dimension_numbers<[2], [2], [1], [1], [0, 0, 0, 1, 1, 1], [0], [0]>} : vector<2x8x8xf32>, vector<2x8x8xf32>, vector<2x8x8xf32> -> vector<2x8x8xf32>
    %cst_33 = arith.constant -1.000000e+06 : f32
    "tpu.trace_stop"() : () -> ()
    %93 = vector.shape_cast %18 : vector<2x1x8xi1> to vector<2x1x8xi1>
    %94 = vector.broadcast %93 : vector<2x1x8xi1> to vector<2x8x8xi1>
    %95 = vector.broadcast %cst_33 : f32 to vector<2x8x8xf32>
    %96 = arith.select %94, %92, %95 : vector<2x8x8xi1>, vector<2x8x8xf32>
    %cst_34 = arith.constant dense<0xFF800000> : vector<2x8xf32>
    %97 = vector.multi_reduction <maximumf>, %96, %cst_34 [2] : vector<2x8x8xf32> to vector<2x8xf32>
    %98 = vector.shape_cast %97 : vector<2x8xf32> to vector<2x8x1xf32>
    %99 = vector.broadcast %98 : vector<2x8x1xf32> to vector<2x8x8xf32>
    %100 = arith.subf %96, %99 : vector<2x8x8xf32>
    %101 = math.exp %100 : vector<2x8x8xf32>
    %cst_35 = arith.constant dense<0.000000e+00> : vector<2x8xf32>
    %102 = vector.multi_reduction <add>, %101, %cst_35 [2] : vector<2x8x8xf32> to vector<2x8xf32>
    %103 = vector.shape_cast %102 : vector<2x8xf32> to vector<2x8x1xf32>
    %104 = tpu.reciprocal %103 : vector<2x8x1xf32> -> vector<2x8x1xf32>
    %105 = vector.broadcast %104 : vector<2x8x1xf32> to vector<2x8x8xf32>
    %106 = arith.mulf %101, %105 : vector<2x8x8xf32>
    "tpu.trace_start"() <{level = 10 : i32, message = "bqk,bkd->bqd"}> : () -> ()
    %cst_36 = arith.constant dense<0.000000e+00> : vector<2x8x8xf32>
    %107 = tpu.matmul %106, %91, %cst_36 {dimension_numbers = #tpu.dot_dimension_numbers<[2], [1], [1], [2], [0, 0, 0, 1, 1, 2], [0], [0]>} : vector<2x8x8xf32>, vector<2x8x8xf32>, vector<2x8x8xf32> -> vector<2x8x8xf32>
    "tpu.trace_stop"() : () -> ()
    %108 = vector.shape_cast %107 : vector<2x8x8xf32> to vector<16x8xf32>
    %c24 = arith.constant 24 : index
    %c0_37 = arith.constant 0 : index
    %109 = vector.load %arg3[%c24, %c0_37] : memref<32x32xf32, #tpu.memory_space<vmem>>, vector<8x32xf32>
    %cst_38 = arith.constant dense<0.000000e+00> : vector<16x32xf32>
    %110 = tpu.matmul %108, %109, %cst_38 {dimension_numbers = #tpu.dot_dimension_numbers<[1], [0], [0], [1], [0, 0, 1, 1], [], []>} : vector<16x8xf32>, vector<8x32xf32>, vector<16x32xf32> -> vector<16x32xf32>
    %111 = arith.addf %88, %110 : vector<16x32xf32>
    %112 = arith.addf %111, %8 : vector<16x32xf32>
    %cst_39 = arith.constant dense<0.000000e+00> : vector<16xf32>
    %113 = vector.multi_reduction <add>, %112, %cst_39 [1] : vector<16x32xf32> to vector<16xf32>
    %114 = vector.shape_cast %113 : vector<16xf32> to vector<16x1xf32>
    %cst_40 = arith.constant 3.200000e+01 : f32
    %115 = vector.broadcast %cst_40 : f32 to vector<16x1xf32>
    %116 = arith.divf %114, %115 : vector<16x1xf32>
    %117 = vector.broadcast %116 : vector<16x1xf32> to vector<16x32xf32>
    %118 = arith.subf %112, %117 : vector<16x32xf32>
    %119 = arith.mulf %118, %118 : vector<16x32xf32>
    %cst_41 = arith.constant dense<0.000000e+00> : vector<16xf32>
    %120 = vector.multi_reduction <add>, %119, %cst_41 [1] : vector<16x32xf32> to vector<16xf32>
    %121 = vector.shape_cast %120 : vector<16xf32> to vector<16x1xf32>
    %cst_42 = arith.constant 3.200000e+01 : f32
    %122 = vector.broadcast %cst_42 : f32 to vector<16x1xf32>
    %123 = arith.divf %121, %122 : vector<16x1xf32>
    %124 = vector.broadcast %116 : vector<16x1xf32> to vector<16x32xf32>
    %125 = arith.subf %112, %124 : vector<16x32xf32>
    %126 = vector.broadcast %1 : vector<1x32xf32> to vector<16x32xf32>
    %127 = arith.mulf %126, %125 : vector<16x32xf32>
    %cst_43 = arith.constant 9.99999974E-6 : f32
    %128 = vector.broadcast %cst_43 : f32 to vector<16x1xf32>
    %129 = arith.addf %123, %128 : vector<16x1xf32>
    %130 = math.rsqrt %129 : vector<16x1xf32>
    %131 = vector.broadcast %130 : vector<16x1xf32> to vector<16x32xf32>
    %132 = arith.mulf %127, %131 : vector<16x32xf32>
    %133 = vector.broadcast %2 : vector<1x32xf32> to vector<16x32xf32>
    %134 = arith.addf %132, %133 : vector<16x32xf32>
    %c0_44 = arith.constant 0 : index
    %c0_45 = arith.constant 0 : index
    %135 = vector.load %arg4[%c0_44, %c0_45] : memref<32x64xf32, #tpu.memory_space<vmem>>, vector<32x64xf32>
    %cst_46 = arith.constant dense<0.000000e+00> : vector<16x64xf32>
    %136 = tpu.matmul %134, %135, %cst_46 {dimension_numbers = #tpu.dot_dimension_numbers<[1], [0], [0], [1], [0, 0, 1, 1], [], []>} : vector<16x32xf32>, vector<32x64xf32>, vector<16x64xf32> -> vector<16x64xf32>
    %137 = vector.broadcast %3 : vector<1x64xf32> to vector<16x64xf32>
    %138 = arith.addf %136, %137 : vector<16x64xf32>
    %cst_47 = arith.constant 0.000000e+00 : f32
    %139 = vector.broadcast %cst_47 : f32 to vector<16x64xf32>
    %140 = arith.maximumf %138, %139 : vector<16x64xf32>
    %c0_48 = arith.constant 0 : index
    %c0_49 = arith.constant 0 : index
    %141 = vector.load %arg5[%c0_48, %c0_49] : memref<64x32xf32, #tpu.memory_space<vmem>>, vector<64x32xf32>
    %cst_50 = arith.constant dense<0.000000e+00> : vector<16x32xf32>
    %142 = tpu.matmul %140, %141, %cst_50 {dimension_numbers = #tpu.dot_dimension_numbers<[1], [0], [0], [1], [0, 0, 1, 1], [], []>} : vector<16x64xf32>, vector<64x32xf32>, vector<16x32xf32> -> vector<16x32xf32>
    %143 = vector.broadcast %4 : vector<1x32xf32> to vector<16x32xf32>
    %144 = arith.addf %142, %143 : vector<16x32xf32>
    %145 = arith.addf %144, %134 : vector<16x32xf32>
    %cst_51 = arith.constant dense<0.000000e+00> : vector<16xf32>
    %146 = vector.multi_reduction <add>, %145, %cst_51 [1] : vector<16x32xf32> to vector<16xf32>
    %147 = vector.shape_cast %146 : vector<16xf32> to vector<16x1xf32>
    %cst_52 = arith.constant 3.200000e+01 : f32
    %148 = vector.broadcast %cst_52 : f32 to vector<16x1xf32>
    %149 = arith.divf %147, %148 : vector<16x1xf32>
    %150 = vector.broadcast %149 : vector<16x1xf32> to vector<16x32xf32>
    %151 = arith.subf %145, %150 : vector<16x32xf32>
    %152 = arith.mulf %151, %151 : vector<16x32xf32>
    %cst_53 = arith.constant dense<0.000000e+00> : vector<16xf32>
    %153 = vector.multi_reduction <add>, %152, %cst_53 [1] : vector<16x32xf32> to vector<16xf32>
    %154 = vector.shape_cast %153 : vector<16xf32> to vector<16x1xf32>
    %cst_54 = arith.constant 3.200000e+01 : f32
    %155 = vector.broadcast %cst_54 : f32 to vector<16x1xf32>
    %156 = arith.divf %154, %155 : vector<16x1xf32>
    %157 = vector.broadcast %149 : vector<16x1xf32> to vector<16x32xf32>
    %158 = arith.subf %145, %157 : vector<16x32xf32>
    %159 = vector.broadcast %5 : vector<1x32xf32> to vector<16x32xf32>
    %160 = arith.mulf %159, %158 : vector<16x32xf32>
    %cst_55 = arith.constant 9.99999974E-6 : f32
    %161 = vector.broadcast %cst_55 : f32 to vector<16x1xf32>
    %162 = arith.addf %156, %161 : vector<16x1xf32>
    %163 = math.rsqrt %162 : vector<16x1xf32>
    %164 = vector.broadcast %163 : vector<16x1xf32> to vector<16x32xf32>
    %165 = arith.mulf %160, %164 : vector<16x32xf32>
    %166 = vector.broadcast %6 : vector<1x32xf32> to vector<16x32xf32>
    %167 = arith.addf %165, %166 : vector<16x32xf32>
    %168 = vector.shape_cast %167 : vector<16x32xf32> to vector<2x8x32xf32>
    %c0_56 = arith.constant 0 : index
    %c0_57 = arith.constant 0 : index
    %c0_58 = arith.constant 0 : index
    %169 = vector.load %arg7[%c0_56, %c0_57, %c0_58] : memref<2x8x32xf32, #tpu.memory_space<vmem>>, vector<2x8x32xf32>
    tpu.vector_store %arg7[%c0_56, %c0_57, %c0_58], %168 {strides = array<i32>} : memref<2x8x32xf32, #tpu.memory_space<vmem>>, vector<2x8x32xf32>,
    return
  }
}

</mosaic_0001>

<bundles_post_ra>
// kernel: tpu_custom_call.1
= control target key start
LH: loop header
LB: loop body
LE: loop exit
PB: predicated region body
PF: predicated region fallthrough
CT: control target
= control target key end

     0   :  { %12 = vsyncpa [#allocation3], 0  ;;  %s1515_s0 = inlined_call_operand.vmem [shape: s32[2,1,1], index: 0, kind: input, shape index: {}]   ;;  %s1516_s1 = inlined_call_operand.hbm [shape: f32[2,8,32], index: 1, kind: input, shape index: {}]   ;;  %s1517_s2 = inlined_call_operand.vmem [shape: f32[32,96], index: 2, kind: input, shape index: {}]   ;;  %s1518_s3 = inlined_call_operand.vmem [shape: f32[32,32], index: 3, kind: input, shape index: {}]   ;;  %s1519_s4 = inlined_call_operand.vmem [shape: f32[32,64], index: 4, kind: input, shape index: {}]   ;;  %s1520_s5 = inlined_call_operand.vmem [shape: f32[64,32], index: 5, kind: input, shape index: {}]   ;;  %s1521_s6 = inlined_call_operand.vmem [shape: f32[6,64], index: 6, kind: input, shape index: {}]   ;;  %s1522_s7 = inlined_call_operand.hbm [shape: f32[2,8,32], index: 7, kind: output, shape index: {}]  }
   0x1   :  { %13 = vsyncpa [#allocation4], 0  ;;  %s20_s26 = sshll.u32 %s1516_s1, 4  ;;  %s1211_s27 = smov [#allocation2]   ;;  %s21_s26 = int_to_ptr.hbm [resolvable:$true] %s20_s26 }
   0x2   :  { %s22_s28 = sshll.u32 %s1211_s27, 4  ;;  %s1212_s29 = smov 128   ;;  %s23_s28 = int_to_ptr.vmem [resolvable:$true] %s22_s28 }
   0x3   :  { %s1213_s30 = smov 8  }
   0x4   :  { %28 = dma.hbm_to_vmem [thread:$0]  %s21_s26, 256, %s23_s28, [#allocation3], %s1212_s29, %s1212_s29, %s1213_s30  }
   0x5   :  { %1207 = dma.done.wait [#allocation3], 256  }
   0x6   :  { %1208 = vsyncadd [#allocation3], 4294967040  ;;  %v49_v0 = vld [vmem:[%s1517_s2 + $0x18] sm:$0xff]  ;;  %v48_v1 = vld [vmem:[%s1517_s2 + $0x10] sm:$0xff]  ;;  %vm50_vm0 = vcmask 261120   ;;  %s1214_s15 = smov 88   ;;  %v80_v15 = vlaneseq }
   0x7   :  { %69 = vmatpush.msra.mxu0 %v49_v0  ;;  %v47_v2 = vld [vmem:[%s1517_s2 + $0x8] sm:$0xff]  ;;  %v46_v3 = vld [vmem:[%s1517_s2] sm:$0xff]  ;;  %s1215_s2 = smov 96   ;;  %s1216_s16 = smov 120   ;;  %v1217_v9 = vmov 0   ;;  %vm97_vm1 = vcmask 64512  }
   0x8   :  { %v1286_v4 = vld [vmem:[#allocation2] sm:$0xff]  ;;  %v1290_v5 = vld [vmem:[#allocation2 + $0x8] sm:$0xff]  ;;  %1115 = vset.pattern.permute.xlu2 %v1217_v9  ;;  %1116 = vset.pattern.permute.xlu0 %v1217_v9  ;;  %v81_v17 = vand.u32 127, %v80_v15  ;;  %s1219_s21 = smov 56   ;;  %s1220_s22 = smov 80  }
   0x9   :  { %70 = vmatpush.msra.mxu0 %v48_v1  ;;  %v82_v8 = vld [vmem:[%s1515_s0] sm:$0x1]  ;;  %v83_v10 = vld [vmem:[%s1515_s0 + $0x1] sm:$0x1]  ;;  %s1218_s0 = smov 64   ;;  %s1221_s23 = smov 112  }
   0xa   :  { %85 = vperm.xlu2 %1115, %v82_v8   ;;  %s1222_s28 = smov 48   ;;  %s1223_s8 = smov 104  }
   0xb   :  { %71 = vmatpush.msra.mxu0 %v47_v2  ;;  %s1224_s9 = smov 72   ;;  %s1225_s1 = smov 40  }
   0xd   :  { %72 = vmatpush.msra.mxu0 %v46_v3 }
   0xe   :  { %1060 = vmatmul.msk.f32.vlgmr.msra.gmra.mxu0 %vm50_vm0, %v1286_v4 }
  0x12   :  { %89 = vperm.xlu2 %1115, %v83_v10  }
  0x16   :  { %1061 = vmatmul.msk.f32.gmra.mxu0 %vm50_vm0, %v1290_v5 }
  0x64   :  { %v86_v16 = vpop.permute.xlu2 %85 }
  0x65   :  { %v87_v18 = vperm.slane %v86_v16, 0 }
  0x67   :  { %vm1318_vm2 = vcmp.lt.s32.totalorder %v81_v17, %v87_v18 }
  0x6c   :  { %v90_v25 = vpop.permute.xlu2 %89 }
  0x6d   :  { %v91_v27 = vperm.slane %v90_v25, 0 }
  0x6f   :  { %vm1328_vm3 = vcmp.lt.s32.totalorder %v81_v17, %v91_v27 }
  0x8b   :  { %v1294_v6 = vpop.f32.mrf.mxu0 }
  0x8c   :  { %258 = vrot.lane.b32.xlu1 %v1294_v6, %s1214_s15  ;;  %95 = vrot.lane.b32.xlu0 %v1294_v6, %s1215_s2 }
  0x93   :  { %v1299_v7 = vpop.f32.mrf.mxu0 }
  0x94   :  { %256 = vrot.lane.b32.xlu1 %v1294_v6, %s1216_s16  ;;  %123 = vrot.lane.b32.xlu0 %v1299_v7, %s1215_s2 }
  0xfe   :  { %v259_v11 = vpop.permute.xlu1 %258  ;;  %v96_v12 = vpop.permute.xlu0 %95 }
  0xff   :  { %1062 = vmatpush.xpose.msk.msrb.mxu0 %vm97_vm1, %v96_v12  ;;  %1068 = vmatpush.xpose.msk.msra.mxu1 %vm97_vm1, %v259_v11 }
 0x102   :  { %1063 = vmatmul.msk.f32.vlgmr.msrb.gmra.mxu0 %vm97_vm1, %v1294_v6 }
 0x106   :  { %v257_v13 = vpop.permute.xlu1 %256  ;;  %v124_v14 = vpop.permute.xlu0 %123 }
 0x107   :  { %1064 = vmatpush.xpose.msk.msra.mxu2 %vm97_vm1, %v124_v14  ;;  %1069 = vmatmul.msk.f32.vlgmr.msra.gmra.mxu1 %vm97_vm1, %v257_v13 }
 0x10a   :  { %1065 = vmatmul.msk.f32.vlgmr.msra.gmra.mxu2 %vm97_vm1, %v1299_v7 }
 0x17f   :  { %v119_v20 = vpop.f32.mrf.mxu0 }
 0x180   :  { %v153_v21 = vsel %vm1318_vm2, %v119_v20, -1000000.0 }
 0x181   :  { %v155_v22 = vsel %vm97_vm1, %v153_v21, -inf }
 0x182   :  { %156 = vmax.xlane.f32.xlu0 %v155_v22 }
 0x184   :  { %v281_v23 = vpop.f32.mrf.mxu1 }
 0x185   :  { %v312_v24 = vsel %vm1318_vm2, %v281_v23, -1000000.0 }
 0x186   :  { %v314_v26 = vsel %vm97_vm1, %v312_v24, -inf }
 0x187   :  { %315 = vmax.xlane.f32.xlu2 %v314_v26 }
 0x18d   :  { %v146_v29 = vpop.f32.mrf.mxu2 }
 0x18e   :  { %v154_v30 = vsel %vm1328_vm3, %v146_v29, -1000000.0 }
 0x18f   :  { %v158_v31 = vsel %vm97_vm1, %v154_v30, -inf }
 0x190   :  { %159 = vmax.xlane.f32.xlu1 %v158_v31 }
 0x196   :  { %229 = vrot.lane.b32.xlu0 %v1299_v7, %s1218_s0 }
 0x19e   :  { %284 = vrot.lane.b32.xlu0 %v1299_v7, %s1216_s16 }
 0x19f   :  { %203 = vrot.lane.b32.xlu2 %v1294_v6, %s1218_s0 }
 0x1a9   :  { %286 = vrot.lane.b32.xlu1 %v1299_v7, %s1214_s15  ;;  %s1047_s15 = sshll.u32 %s1522_s7, 4  ;;  %s1048_s15 = int_to_ptr.hbm [resolvable:$true] %s1047_s15 }
 0x1f5   :  { %v157_v32 = vpop.xlane.xlu0 %156 }
 0x1f6   :  { %v161_v33 = vsub.f32 %v153_v21, %v157_v32 }
 0x1f8   :  { %v163_v34 = vmul.f32 1.442695, %v161_v33 }
 0x1fa   :  { %1117 = vpow2.f32 %v163_v34  ;;  %v316_v35 = vpop.xlane.xlu2 %315 }
 0x1fb   :  { %v320_v36 = vsub.f32 %v312_v24, %v316_v35  ;;  %v255_v35 = vld [vmem:[%s1518_s3] sm:$0xff] }
 0x1fc   :  { %465 = vmatpush.msra.mxu0 %v255_v35 }
 0x1fd   :  { %v322_v37 = vmul.f32 1.442695, %v320_v36  ;;  %v414_v36 = vld [vmem:[%s1518_s3 + $0x8] sm:$0xff] }
 0x1ff   :  { %1119 = vpow2.f32 %v322_v37 }
 0x200   :  { %v1118_v38 = vpop.eup %1117 }
 0x201   :  { %v167_v39 = vsel %vm97_vm1, %v1118_v38, 0.0 }
 0x202   :  { %v204_v40 = vpop.permute.xlu2 %203  ;;  %168 = vadd.xlane.f32.xlu2 %v167_v39 }
 0x203   :  { %224 = vmatpush.msra.mxu3 %v204_v40  ;;  %v160_v41 = vpop.xlane.xlu1 %159 }
 0x204   :  { %v162_v42 = vsub.f32 %v154_v30, %v160_v41 }
 0x205   :  { %v1342_v43 = vpop.eup %1119 }
 0x206   :  { %v165_v44 = vmul.f32 1.442695, %v162_v42  ;;  %v326_v45 = vsel %vm97_vm1, %v1342_v43, 0.0 }
 0x207   :  { %327 = vadd.xlane.f32.xlu1 %v326_v45 }
 0x208   :  { %1121 = vpow2.f32 %v165_v44  ;;  %v230_v46 = vpop.permute.xlu0 %229 }
 0x209   :  { %250 = vmatpush.msrb.mxu3 %v230_v46 }
 0x20e   :  { %v1122_v47 = vpop.eup %1121 }
 0x20f   :  { %v170_v48 = vsel %vm97_vm1, %v1122_v47, 0.0 }
 0x210   :  { %171 = vadd.xlane.f32.xlu0 %v170_v48  ;;  %v285_v50 = vpop.permute.xlu0 %284 }
 0x21a   :  { %362 = vrot.lane.b32.xlu2 %v1294_v6, %s1219_s21 }
 0x21b   :  { %v287_v49 = vpop.permute.xlu1 %286 }
 0x21c   :  { %1070 = vmatpush.xpose.msk.msrb.mxu2 %vm97_vm1, %v287_v49 }
 0x21f   :  { %1071 = vmatmul.msk.f32.vlgmr.msrb.gmra.mxu2 %vm97_vm1, %v285_v50 }
 0x220   :  { %475 = vrot.lane.b32.xlu1 %v1294_v6, %s1220_s22  ;;  %436 = vmatpush.msra.mxu2 %v414_v36  ;;  %v631_v36 = vld [vmem:[%s1518_s3 + $0x10] sm:$0xff] }
 0x222   :  { %653 = vmatpush.msrb.mxu2 %v631_v36 }
 0x224   :  { %473 = vrot.lane.b32.xlu0 %v1294_v6, %s1221_s23 }
 0x275   :  { %v169_v51 = vpop.xlane.xlu2 %168 }
 0x276   :  { %1123 = vrcp.f32 %v169_v51  ;;  %v184_v56 = vand.u32 2147483648, %v169_v51  ;;  %v182_v58 = vand.u32 2147483647, %v169_v51  ;;  %vm178_vm5 = vweird.f32 %v169_v51 }
 0x278   :  { %v185_v62 = vor.u32 1.1754944e-38, %v184_v56  ;;  %vm183_vm7 = vcmp.eq.f32.partialorder %v182_v58, 8.507059e+37 }
 0x27a   :  { %v328_v52 = vpop.xlane.xlu1 %327 }
 0x27b   :  { %1125 = vrcp.f32 %v328_v52  ;;  %v343_v21 = vand.u32 2147483648, %v328_v52  ;;  %vm337_vm13 = vweird.f32 %v328_v52  ;;  %v341_v23 = vand.u32 2147483647, %v328_v52 }
 0x27c   :  { %v1124_v53 = vpop.eup %1123 }
 0x27d   :  { %v174_v54 = vmul.f32 %v1124_v53, %v169_v51  ;;  %vm179_vm4 = vweird.f32 %v1124_v53  ;;  %v363_v3 = vpop.permute.xlu2 %362  ;;  %v344_v27 = vor.u32 1.1754944e-38, %v343_v21  ;;  %vm342_vm15 = vcmp.eq.f32.partialorder %v341_v23, 8.507059e+37 }
 0x27e   :  { %vm180_vm6 = vmor %vm178_vm5, %vm179_vm4 }
 0x27f   :  { %v175_v55 = vsub.f32 1.0, %v174_v54 }
 0x281   :  { %v176_v57 = vmul.f32 %v1124_v53, %v175_v55  ;;  %v1126_v61 = vpop.eup %1125 }
 0x282   :  { %v333_v1 = vmul.f32 %v1126_v61, %v328_v52  ;;  %vm338_vm11 = vweird.f32 %v1126_v61 }
 0x283   :  { %v172_v59 = vpop.xlane.xlu0 %171  ;;  %v177_v60 = vadd.f32 %v1124_v53, %v176_v57  ;;  %vm339_vm14 = vmor %vm337_vm13, %vm338_vm11 }
 0x284   :  { %1127 = vrcp.f32 %v172_v59  ;;  %v334_v9 = vsub.f32 1.0, %v333_v1  ;;  %v198_v12 = vand.u32 2147483648, %v172_v59  ;;  %v196_v15 = vand.u32 2147483647, %v172_v59 }
 0x285   :  { %v181_v63 = vsel %vm180_vm6, %v1124_v53, %v177_v60  ;;  %vm192_vm9 = vweird.f32 %v172_v59 }
 0x286   :  { %v186_v0 = vsel %vm183_vm7, %v185_v62, %v181_v63  ;;  %v335_v13 = vmul.f32 %v1126_v61, %v334_v9  ;;  %v199_v17 = vor.u32 1.1754944e-38, %v198_v12  ;;  %vm197_vm12 = vcmp.eq.f32.partialorder %v196_v15, 8.507059e+37 }
 0x287   :  { %v201_v2 = vmul.f32 %v1118_v38, %v186_v0 }
 0x288   :  { %v336_v18 = vadd.f32 %v1126_v61, %v335_v13 }
 0x289   :  { %1066 = vmatmul.msk.f32.vlgmr.msra.gmra.mxu3 %vm97_vm1, %v201_v2 }
 0x28a   :  { %v1128_v8 = vpop.eup %1127  ;;  %383 = vmatpush.msra.mxu3 %v363_v3  ;;  %v340_v25 = vsel %vm339_vm14, %v1126_v61, %v336_v18 }
 0x28b   :  { %v188_v10 = vmul.f32 %v1128_v8, %v172_v59  ;;  %vm193_vm8 = vweird.f32 %v1128_v8  ;;  %v345_v29 = vsel %vm342_vm15, %v344_v27, %v340_v25 }
 0x28c   :  { %vm194_vm10 = vmor %vm192_vm9, %vm193_vm8  ;;  %v360_v30 = vmul.f32 %v1342_v43, %v345_v29 }
 0x28d   :  { %v189_v11 = vsub.f32 1.0, %v188_v10 }
 0x28f   :  { %v190_v14 = vmul.f32 %v1128_v8, %v189_v11 }
 0x291   :  { %v191_v16 = vadd.f32 %v1128_v8, %v190_v14 }
 0x292   :  { %v476_v26 = vpop.permute.xlu1 %475 }
 0x293   :  { %v195_v20 = vsel %vm194_vm10, %v1128_v8, %v191_v16 }
 0x294   :  { %v200_v22 = vsel %vm197_vm12, %v199_v17, %v195_v20 }
 0x295   :  { %v202_v24 = vmul.f32 %v1122_v47, %v200_v22 }
 0x296   :  { %v474_v34 = vpop.permute.xlu0 %473 }
 0x297   :  { %1067 = vmatmul.msk.f32.vlgmr.msrb.gmra.mxu3 %vm97_vm1, %v202_v24 }
 0x298   :  { %1078 = vmatpush.xpose.msk.msrb.mxu3 %vm97_vm1, %v476_v26 }
 0x29f   :  { %1072 = vmatmul.msk.f32.vlgmr.msra.gmra.mxu3 %vm97_vm1, %v360_v30 }
 0x2a2   :  { %v309_v31 = vpop.f32.mrf.mxu2 }
 0x2a3   :  { %v313_v32 = vsel %vm1328_vm3, %v309_v31, -1000000.0 }
 0x2a4   :  { %v317_v33 = vsel %vm97_vm1, %v313_v32, -inf }
 0x2a5   :  { %318 = vmax.xlane.f32.xlu2 %v317_v33 }
 0x2a7   :  { %1079 = vmatmul.msk.f32.vlgmr.msrb.gmra.mxu3 %vm97_vm1, %v474_v34 }
 0x2bd   :  { %501 = vrot.lane.b32.xlu2 %v1299_v7, %s1221_s23 }
 0x30c   :  { %v226_v37 = vpop.f32.mrf.mxu3 }
 0x30d   :  { %1076 = vmatmul.msk.f32.vlgmr.msra.gmra.mxu0 %vm97_vm1, %v226_v37 }
 0x318   :  { %v319_v38 = vpop.xlane.xlu2 %318 }
 0x319   :  { %v321_v39 = vsub.f32 %v313_v32, %v319_v38 }
 0x31a   :  { %v252_v40 = vpop.f32.mrf.mxu3 }
 0x31b   :  { %v324_v41 = vmul.f32 1.442695, %v321_v39  ;;  %1077 = vmatmul.msk.f32.gmra.mxu0 %vm97_vm1, %v252_v40 }
 0x31d   :  { %1129 = vpow2.f32 %v324_v41 }
 0x320   :  { %v502_v9 = vpop.permute.xlu2 %501 }
 0x322   :  { %v385_v42 = vpop.f32.mrf.mxu3 }
 0x323   :  { %v1130_v43 = vpop.eup %1129  ;;  %1074 = vmatmul.msk.f32.vlgmr.msra.gmra.mxu2 %vm97_vm1, %v385_v42 }
 0x324   :  { %v329_v44 = vsel %vm97_vm1, %v1130_v43, 0.0 }
 0x325   :  { %330 = vadd.xlane.f32.xlu0 %v329_v44 }
 0x32a   :  { %v498_v45 = vpop.f32.mrf.mxu3 }
 0x32b   :  { %v529_v46 = vsel %vm1318_vm2, %v498_v45, -1000000.0 }
 0x32c   :  { %v531_v47 = vsel %vm97_vm1, %v529_v46, -inf }
 0x32d   :  { %532 = vmax.xlane.f32.xlu1 %v531_v47 }
 0x339   :  { %503 = vrot.lane.b32.xlu0 %v1299_v7, %s1220_s22 }
 0x341   :  { %579 = vrot.lane.b32.xlu0 %v1294_v6, %s1222_s28 }
 0x346   :  { %388 = vrot.lane.b32.xlu1 %v1299_v7, %s1219_s21 }
 0x349   :  { %663 = vrot.lane.b32.xlu0 %v1294_v6, %s1223_s8 }
 0x34e   :  { %665 = vrot.lane.b32.xlu1 %v1294_v6, %s1224_s9 }
 0x356   :  { %691 = vrot.lane.b32.xlu1 %v1299_v7, %s1223_s8 }
 0x38a   :  { %v1398_v23 = vpop.f32.mrf.mxu0 }
 0x398   :  { %v331_v48 = vpop.xlane.xlu0 %330  ;;  %v1402_v27 = vpop.f32.mrf.mxu0 }
 0x399   :  { %1131 = vrcp.f32 %v331_v48  ;;  %v357_v60 = vand.u32 2147483648, %v331_v48  ;;  %vm351_vm5 = vweird.f32 %v331_v48  ;;  %v355_v61 = vand.u32 2147483647, %v331_v48 }
 0x39b   :  { %v358_v63 = vor.u32 1.1754944e-38, %v357_v60  ;;  %vm356_vm7 = vcmp.eq.f32.partialorder %v355_v61, 8.507059e+37 }
 0x39f   :  { %v1132_v49 = vpop.eup %1131 }
 0x3a0   :  { %v533_v50 = vpop.xlane.xlu1 %532  ;;  %v347_v52 = vmul.f32 %v1132_v49, %v331_v48  ;;  %vm352_vm4 = vweird.f32 %v1132_v49 }
 0x3a1   :  { %v537_v51 = vsub.f32 %v529_v46, %v533_v50  ;;  %vm353_vm6 = vmor %vm351_vm5, %vm352_vm4 }
 0x3a2   :  { %v348_v54 = vsub.f32 1.0, %v347_v52 }
 0x3a3   :  { %v539_v53 = vmul.f32 1.442695, %v537_v51 }
 0x3a4   :  { %v349_v55 = vmul.f32 %v1132_v49, %v348_v54 }
 0x3a5   :  { %1133 = vpow2.f32 %v539_v53 }
 0x3a6   :  { %v350_v59 = vadd.f32 %v1132_v49, %v349_v55 }
 0x3a8   :  { %v354_v62 = vsel %vm353_vm6, %v1132_v49, %v350_v59 }
 0x3a9   :  { %v359_v1 = vsel %vm356_vm7, %v358_v63, %v354_v62 }
 0x3aa   :  { %v361_v3 = vmul.f32 %v1130_v43, %v359_v1 }
 0x3ab   :  { %v1134_v56 = vpop.eup %1133  ;;  %v504_v57 = vpop.permute.xlu0 %503 }
 0x3ac   :  { %v543_v58 = vsel %vm97_vm1, %v1134_v56, 0.0 }
 0x3ad   :  { %544 = vadd.xlane.f32.xlu2 %v543_v58 }
 0x3b3   :  { %v580_v0 = vpop.permute.xlu0 %579 }
 0x3b4   :  { %600 = vmatpush.msra.mxu3 %v580_v0 }
 0x3b8   :  { %v389_v2 = vpop.permute.xlu1 %388 }
 0x3b9   :  { %409 = vmatpush.msrb.mxu1 %v389_v2 }
 0x3ba   :  { %1073 = vmatmul.msk.f32.vlgmr.msrb.gmra.mxu1 %vm97_vm1, %v361_v3 }
 0x3bb   :  { %1080 = vmatpush.xpose.msk.msra.mxu1 %vm97_vm1, %v504_v57  ;;  %v664_v10 = vpop.permute.xlu0 %663 }
 0x3c0   :  { %v666_v8 = vpop.permute.xlu1 %665 }
 0x3c1   :  { %1086 = vmatpush.xpose.msk.msrb.mxu0 %vm97_vm1, %v666_v8 }
 0x3c2   :  { %1081 = vmatmul.msk.f32.vlgmr.msra.gmra.mxu1 %vm97_vm1, %v502_v9 }
 0x3c4   :  { %1087 = vmatmul.msk.f32.vlgmr.msrb.gmra.mxu0 %vm97_vm1, %v664_v10 }
 0x3c5   :  { %693 = vrot.lane.b32.xlu2 %v1299_v7, %s1224_s9 }
 0x3c8   :  { %v692_v29 = vpop.permute.xlu1 %691 }
 0x420   :  { %v545_v11 = vpop.xlane.xlu2 %544 }
 0x421   :  { %1135 = vrcp.f32 %v545_v11  ;;  %v560_v16 = vand.u32 2147483648, %v545_v11  ;;  %v558_v18 = vand.u32 2147483647, %v545_v11  ;;  %vm554_vm9 = vweird.f32 %v545_v11 }
 0x423   :  { %v561_v21 = vor.u32 1.1754944e-38, %v560_v16  ;;  %vm559_vm11 = vcmp.eq.f32.partialorder %v558_v18, 8.507059e+37 }
 0x427   :  { %v1136_v12 = vpop.eup %1135 }
 0x428   :  { %v550_v13 = vmul.f32 %v1136_v12, %v545_v11  ;;  %v694_v14 = vpop.permute.xlu2 %693  ;;  %vm555_vm8 = vweird.f32 %v1136_v12 }
 0x429   :  { %1088 = vmatpush.xpose.msk.msrb.mxu3 %vm97_vm1, %v694_v14  ;;  %vm556_vm10 = vmor %vm554_vm9, %vm555_vm8 }
 0x42a   :  { %v551_v15 = vsub.f32 1.0, %v550_v13 }
 0x42c   :  { %v552_v17 = vmul.f32 %v1136_v12, %v551_v15 }
 0x42e   :  { %v553_v20 = vadd.f32 %v1136_v12, %v552_v17 }
 0x430   :  { %v557_v22 = vsel %vm556_vm10, %v1136_v12, %v553_v20  ;;  %v821_v20 = vld [vmem:[%s1518_s3 + $0x18] sm:$0xff] }
 0x431   :  { %v562_v24 = vsel %vm559_vm11, %v561_v21, %v557_v22 }
 0x432   :  { %v577_v25 = vmul.f32 %v1134_v56, %v562_v24 }
 0x434   :  { %1082 = vmatmul.msk.f32.vlgmr.msra.gmra.mxu3 %vm97_vm1, %v577_v25 }
 0x435   :  { %843 = vmatpush.msra.mxu3 %v821_v20 }
 0x437   :  { %v411_v26 = vpop.f32.mrf.mxu1 }
 0x438   :  { %1075 = vmatmul.msk.f32.gmra.mxu2 %vm97_vm1, %v411_v26 }
 0x43c   :  { %1089 = vmatmul.msk.f32.vlgmr.msrb.gmra.mxu3 %vm97_vm1, %v692_v29 }
 0x43f   :  { %v526_v30 = vpop.f32.mrf.mxu1 }
 0x440   :  { %v530_v31 = vsel %vm1328_vm3, %v526_v30, -1000000.0 }
 0x441   :  { %v688_v32 = vpop.f32.mrf.mxu0  ;;  %v534_v33 = vsel %vm97_vm1, %v530_v31, -inf }
 0x442   :  { %v719_v34 = vsel %vm1318_vm2, %v688_v32, -1000000.0  ;;  %535 = vmax.xlane.f32.xlu2 %v534_v33 }
 0x443   :  { %v721_v35 = vsel %vm97_vm1, %v719_v34, -inf }
 0x444   :  { %722 = vmax.xlane.f32.xlu0 %v721_v35 }
 0x4b5   :  { %v536_v37 = vpop.xlane.xlu2 %535 }
 0x4b6   :  { %v538_v38 = vsub.f32 %v530_v31, %v536_v37 }
 0x4b7   :  { %v602_v39 = vpop.f32.mrf.mxu3  ;;  %v723_v40 = vpop.xlane.xlu0 %722 }
 0x4b8   :  { %v541_v41 = vmul.f32 1.442695, %v538_v38  ;;  %v727_v42 = vsub.f32 %v719_v34, %v723_v40  ;;  %1084 = vmatmul.msk.f32.vlgmr.msrb.gmra.mxu2 %vm97_vm1, %v602_v39  ;;  %v438_v38 = vpop.f32.mrf.mxu2 }
 0x4ba   :  { %1137 = vpow2.f32 %v541_v41  ;;  %v729_v19 = vmul.f32 1.442695, %v727_v42  ;;  %v468_v42 = vadd.f32 %v1398_v23, %v438_v38 }
 0x4bc   :  { %1139 = vpow2.f32 %v729_v19 }
 0x4bf   :  { %v716_v43 = vpop.f32.mrf.mxu3 }
 0x4c0   :  { %v1138_v44 = vpop.eup %1137  ;;  %v720_v45 = vsel %vm1328_vm3, %v716_v43, -1000000.0  ;;  %v441_v39 = vpop.f32.mrf.mxu2 }
 0x4c1   :  { %v546_v46 = vsel %vm97_vm1, %v1138_v44, 0.0  ;;  %v724_v47 = vsel %vm97_vm1, %v720_v45, -inf }
 0x4c2   :  { %v1140_v48 = vpop.eup %1139  ;;  %547 = vadd.xlane.f32.xlu2 %v546_v46  ;;  %725 = vmax.xlane.f32.xlu1 %v724_v47  ;;  %v1226_v47 = vmov 32.0  }
 0x4c3   :  { %v733_v49 = vsel %vm97_vm1, %v1140_v48, 0.0 }
 0x4c4   :  { %734 = vadd.xlane.f32.xlu0 %v733_v49 }
 0x4d8   :  { %769 = vrot.lane.b32.xlu0 %v1294_v6, %s1225_s1 }
 0x4da   :  { %605 = vrot.lane.b32.xlu2 %v1299_v7, %s1222_s28 }
 0x535   :  { %v548_v50 = vpop.xlane.xlu2 %547  ;;  %v726_v28 = vpop.xlane.xlu1 %725 }
 0x536   :  { %1141 = vrcp.f32 %v548_v50  ;;  %v728_v51 = vsub.f32 %v720_v45, %v726_v28  ;;  %v574_v60 = vand.u32 2147483648, %v548_v50  ;;  %v572_v62 = vand.u32 2147483647, %v548_v50 }
 0x537   :  { %v735_v52 = vpop.xlane.xlu0 %734  ;;  %vm568_vm3 = vweird.f32 %v548_v50 }
 0x538   :  { %1143 = vrcp.f32 %v735_v52  ;;  %v731_v53 = vmul.f32 1.442695, %v728_v51  ;;  %v575_v3 = vor.u32 1.1754944e-38, %v574_v60  ;;  %vm573_vm13 = vcmp.eq.f32.partialorder %v572_v62, 8.507059e+37  ;;  %v915_v62 = vld [vmem:[%s1519_s4 + $0x18] sm:$0xff] }
 0x539   :  { %v750_v11 = vand.u32 2147483648, %v735_v52  ;;  %vm744_vm15 = vweird.f32 %v735_v52  ;;  %v748_v12 = vand.u32 2147483647, %v735_v52 }
 0x53a   :  { %1145 = vpow2.f32 %v731_v53 }
 0x53b   :  { %v751_v15 = vor.u32 1.1754944e-38, %v750_v11  ;;  %vm749_vm5 = vcmp.eq.f32.partialorder %v748_v12, 8.507059e+37  ;;  %v655_v41 = vpop.f32.mrf.mxu2 }
 0x53c   :  { %v1142_v54 = vpop.eup %1141  ;;  %v661_v19 = vadd.f32 %v655_v41, %v468_v42 }
 0x53d   :  { %v564_v55 = vmul.f32 %v1142_v54, %v548_v50  ;;  %v606_v56 = vpop.permute.xlu2 %605  ;;  %vm569_vm2 = vweird.f32 %v1142_v54 }
 0x53e   :  { %v1144_v57 = vpop.eup %1143  ;;  %626 = vmatpush.msrb.mxu1 %v606_v56  ;;  %vm570_vm12 = vmor %vm568_vm3, %vm569_vm2 }
 0x53f   :  { %v565_v58 = vsub.f32 1.0, %v564_v55  ;;  %v740_v59 = vmul.f32 %v1144_v57, %v735_v52  ;;  %vm745_vm14 = vweird.f32 %v1144_v57  ;;  %v471_v55 = vadd.f32 %v1402_v27, %v441_v39  ;;  %v914_v27 = vld [vmem:[%s1519_s4 + $0x10] sm:$0xff] }
 0x540   :  { %v1146_v6 = vpop.eup %1145  ;;  %vm746_vm4 = vmor %vm744_vm15, %vm745_vm14  ;;  %vm957_vm14 = vcmask 523264  }
 0x541   :  { %v566_v61 = vmul.f32 %v1142_v54, %v565_v58  ;;  %v741_v63 = vsub.f32 1.0, %v740_v59  ;;  %v736_v0 = vsel %vm97_vm1, %v1146_v6, 0.0 }
 0x542   :  { %737 = vadd.xlane.f32.xlu1 %v736_v0 }
 0x543   :  { %v567_v1 = vadd.f32 %v1142_v54, %v566_v61  ;;  %v742_v2 = vmul.f32 %v1144_v57, %v741_v63  ;;  %v913_v63 = vld [vmem:[%s1519_s4 + $0x8] sm:$0xff] }
 0x545   :  { %v571_v8 = vsel %vm570_vm12, %v1142_v54, %v567_v1  ;;  %v743_v9 = vadd.f32 %v1144_v57, %v742_v2 }
 0x546   :  { %v576_v10 = vsel %vm573_vm13, %v575_v3, %v571_v8 }
 0x547   :  { %v578_v13 = vmul.f32 %v1138_v44, %v576_v10  ;;  %v747_v14 = vsel %vm746_vm4, %v1144_v57, %v743_v9 }
 0x548   :  { %v752_v17 = vsel %vm749_vm5, %v751_v15, %v747_v14  ;;  %v1464_v14 = vld [vmem:[%s1521_s6] sm:$0x3f] }
 0x549   :  { %1083 = vmatmul.msk.f32.vlgmr.msrb.gmra.mxu1 %vm97_vm1, %v578_v13  ;;  %v767_v18 = vmul.f32 %v1140_v48, %v752_v17  ;;  %v882_v17 = vperm.slane %v1464_v14, 0 }
 0x54a   :  { %v770_v16 = vpop.permute.xlu0 %769 }
 0x54b   :  { %790 = vmatpush.msra.mxu1 %v770_v16 }
 0x54d   :  { %935 = vmatpush.msrb.mxu1 %v915_v62 }
 0x54f   :  { %936 = vmatpush.msrb.mxu1 %v914_v27 }
 0x551   :  { %1090 = vmatmul.msk.f32.vlgmr.msra.gmra.mxu1 %vm97_vm1, %v767_v18 }
 0x552   :  { %937 = vmatpush.msrb.mxu1 %v913_v63 }
 0x55b   :  { %795 = vrot.lane.b32.xlu1 %v1299_v7, %s1225_s1 }
 0x5b5   :  { %v738_v21 = vpop.xlane.xlu1 %737 }
 0x5b6   :  { %1147 = vrcp.f32 %v738_v21  ;;  %v764_v30 = vand.u32 2147483648, %v738_v21  ;;  %vm758_vm7 = vweird.f32 %v738_v21  ;;  %v762_v31 = vand.u32 2147483647, %v738_v21 }
 0x5b7   :  { %1149 = vrcp.f32 %v1226_v47 }
 0x5b8   :  { %v765_v33 = vor.u32 1.1754944e-38, %v764_v30  ;;  %vm763_vm9 = vcmp.eq.f32.partialorder %v762_v31, 8.507059e+37  ;;  %v954_v30 = vld [vmem:[%s1520_s5 + $0x30] sm:$0xff]  ;;  %v953_v31 = vld [vmem:[%s1520_s5 + $0x28] sm:$0xff] }
 0x5bc   :  { %v1148_v22 = vpop.eup %1147 }
 0x5bd   :  { %v754_v24 = vmul.f32 %v1148_v22, %v738_v21  ;;  %vm759_vm6 = vweird.f32 %v1148_v22  ;;  %v1150_v48 = vpop.eup %1149 }
 0x5be   :  { %vm760_vm8 = vmor %vm758_vm7, %vm759_vm6  ;;  %v862_v49 = vmul.f32 32.0, %v1150_v48  ;;  %vm866_vm10 = vweird.f32 %v1150_v48 }
 0x5bf   :  { %v755_v25 = vsub.f32 1.0, %v754_v24 }
 0x5c0   :  { %v863_v50 = vsub.f32 1.0, %v862_v49 }
 0x5c1   :  { %v756_v26 = vmul.f32 %v1148_v22, %v755_v25 }
 0x5c2   :  { %v864_v28 = vmul.f32 %v1150_v48, %v863_v50 }
 0x5c3   :  { %v757_v29 = vadd.f32 %v1148_v22, %v756_v26 }
 0x5c4   :  { %v865_v51 = vadd.f32 %v1150_v48, %v864_v28 }
 0x5c5   :  { %v761_v7 = vsel %vm760_vm8, %v1148_v22, %v757_v29  ;;  %v909_v22 = vperm.slane %v1464_v14, 1  ;;  %v955_v29 = vld [vmem:[%s1520_s5 + $0x38] sm:$0xff] }
 0x5c6   :  { %v628_v32 = vpop.f32.mrf.mxu1  ;;  %v766_v34 = vsel %vm763_vm9, %v765_v33, %v761_v7  ;;  %v1439_v52 = vsel %vm866_vm10, %v1150_v48, %v865_v51  ;;  %972 = vmatpush.msra.mxu2 %v955_v29  ;;  %v951_v7 = vld [vmem:[%s1520_s5 + $0x18] sm:$0xff]  ;;  %v950_v33 = vld [vmem:[%s1520_s5 + $0x10] sm:$0xff] }
 0x5c7   :  { %1085 = vmatmul.msk.f32.gmra.mxu2 %vm97_vm1, %v628_v32  ;;  %v768_v37 = vmul.f32 %v1146_v6, %v766_v34  ;;  %v952_v32 = vld [vmem:[%s1520_s5 + $0x20] sm:$0xff]  ;;  %v949_v34 = vld [vmem:[%s1520_s5 + $0x8] sm:$0xff] }
 0x5c8   :  { %973 = vmatpush.msra.mxu2 %v954_v30 }
 0x5ca   :  { %974 = vmatpush.msra.mxu2 %v953_v31 }
 0x5cc   :  { %975 = vmatpush.msra.mxu2 %v952_v32 }
 0x5cd   :  { %v796_v35 = vpop.permute.xlu1 %795 }
 0x5ce   :  { %v792_v36 = vpop.f32.mrf.mxu1  ;;  %816 = vmatpush.msra.mxu0 %v796_v35  ;;  %976 = vmatpush.msra.mxu2 %v951_v7  ;;  %v948_v35 = vld [vmem:[%s1520_s5] sm:$0xff]  ;;  %s1227_s5 = smov [#allocation5]  }
 0x5cf   :  { %1092 = vmatmul.msk.f32.vlgmr.msra.gmra.mxu3 %vm97_vm1, %v792_v36  ;;  %1091 = vmatmul.msk.f32.vlgmr.msra.gmra.mxu0 %vm97_vm1, %v768_v37  ;;  %s1045_s13 = sshll.u32 %s1227_s5, 4  ;;  %s1046_s13 = int_to_ptr.vmem [resolvable:$true] %s1045_s13 }
 0x5d0   :  { %977 = vmatpush.msra.mxu2 %v950_v33 }
 0x5d2   :  { %978 = vmatpush.msra.mxu2 %v949_v34 }
 0x5d4   :  { %979 = vmatpush.msra.mxu2 %v948_v35 }
 0x64a   :  { %v658_v54 = vpop.f32.mrf.mxu2 }
 0x64b   :  { %v662_v56 = vadd.f32 %v658_v54, %v471_v55  ;;  %v956_v54 = vperm.slane %v1464_v14, 3 }
 0x64c   :  { %v818_v40 = vpop.f32.mrf.mxu0 }
 0x64d   :  { %1093 = vmatmul.msk.f32.gmra.mxu3 %vm97_vm1, %v818_v40 }
 0x652   :  { %v845_v43 = vpop.f32.mrf.mxu3 }
 0x653   :  { %v851_v44 = vadd.f32 %v845_v43, %v661_v19 }
 0x655   :  { %v853_v45 = vadd.f32 %v851_v44, %v1286_v4 }
 0x657   :  { %v855_v46 = vsel %vm50_vm0, %v853_v45, 0.0 }
 0x658   :  { %856 = vadd.xlane.f32.xlu0 %v855_v46 }
 0x6cb   :  { %v857_v53 = vpop.xlane.xlu0 %856 }
 0x6cc   :  { %v868_v23 = vmul.f32 %v1439_v52, %v857_v53 }
 0x6ce   :  { %v870_v4 = vsub.f32 %v853_v45, %v868_v23  ;;  %v916_v45 = vperm.slane %v1464_v14, 2 }
 0x6d0   :  { %v872_v57 = vmul.f32 %v870_v4, %v870_v4  ;;  %v848_v58 = vpop.f32.mrf.mxu3  ;;  %v883_v21 = vmul.f32 %v882_v17, %v870_v4 }
 0x6d1   :  { %v852_v59 = vadd.f32 %v848_v58, %v662_v56 }
 0x6d2   :  { %v874_v60 = vsel %vm50_vm0, %v872_v57, 0.0 }
 0x6d3   :  { %875 = vadd.xlane.f32.xlu1 %v874_v60  ;;  %v854_v6 = vadd.f32 %v852_v59, %v1290_v5  ;;  %v912_v5 = vld [vmem:[%s1519_s4] sm:$0xff] }
 0x6d4   :  { %938 = vmatpush.msrb.mxu1 %v912_v5 }
 0x6d5   :  { %v858_v61 = vsel %vm50_vm0, %v854_v6, 0.0 }
 0x6d6   :  { %859 = vadd.xlane.f32.xlu2 %v858_v61 }
 0x746   :  { %v876_v0 = vpop.xlane.xlu1 %875 }
 0x747   :  { %v880_v1 = vmul.f32 %v876_v0, %v1439_v52 }
 0x749   :  { %v885_v2 = vadd.f32 1e-05, %v880_v1  ;;  %v860_v3 = vpop.xlane.xlu2 %859 }
 0x74a   :  { %v869_v8 = vmul.f32 %v1439_v52, %v860_v3 }
 0x74b   :  { %1151 = vrsqrt.f32 %v885_v2  ;;  %vm893_vm11 = vweird.f32 %v885_v2 }
 0x74c   :  { %v871_v9 = vsub.f32 %v854_v6, %v869_v8 }
 0x74e   :  { %v873_v10 = vmul.f32 %v871_v9, %v871_v9  ;;  %v884_v44 = vmul.f32 %v882_v17, %v871_v9  ;;  %v1009_v17 = vperm.slane %v1464_v14, 4 }
 0x750   :  { %v877_v12 = vsel %vm50_vm0, %v873_v10, 0.0 }
 0x751   :  { %v1152_v11 = vpop.eup %1151  ;;  %878 = vadd.xlane.f32.xlu0 %v877_v12 }
 0x752   :  { %v888_v13 = vmul.f32 %v1152_v11, %v885_v2  ;;  %vm894_vm1 = vweird.f32 %v1152_v11 }
 0x753   :  { %vm895_vm2 = vmor %vm893_vm11, %vm894_vm1 }
 0x754   :  { %v889_v15 = vmul.f32 %v1152_v11, %v888_v13 }
 0x756   :  { %v890_v16 = vmul.f32 0.5, %v889_v15 }
 0x758   :  { %v891_v18 = vsub.f32 1.5, %v890_v16 }
 0x75a   :  { %v892_v20 = vmul.f32 %v1152_v11, %v891_v18 }
 0x75c   :  { %v896_v24 = vsel %vm895_vm2, %v1152_v11, %v892_v20 }
 0x75d   :  { %v907_v25 = vmul.f32 %v896_v24, %v883_v21 }
 0x75f   :  { %v910_v26 = vadd.f32 %v909_v22, %v907_v25 }
 0x761   :  { %1094 = vmatmul.msk.f32.vlgmr.msrb.gmra.mxu1 %vm50_vm0, %v910_v26 }
 0x7c4   :  { %v879_v36 = vpop.xlane.xlu0 %878 }
 0x7c5   :  { %v881_v37 = vmul.f32 %v879_v36, %v1439_v52 }
 0x7c7   :  { %v886_v38 = vadd.f32 1e-05, %v881_v37 }
 0x7c9   :  { %1153 = vrsqrt.f32 %v886_v38  ;;  %vm903_vm12 = vweird.f32 %v886_v38 }
 0x7cf   :  { %v1154_v39 = vpop.eup %1153 }
 0x7d0   :  { %v898_v40 = vmul.f32 %v1154_v39, %v886_v38  ;;  %vm904_vm3 = vweird.f32 %v1154_v39 }
 0x7d1   :  { %vm905_vm13 = vmor %vm903_vm12, %vm904_vm3 }
 0x7d2   :  { %v899_v41 = vmul.f32 %v1154_v39, %v898_v40 }
 0x7d4   :  { %v900_v42 = vmul.f32 0.5, %v899_v41 }
 0x7d6   :  { %v901_v19 = vsub.f32 1.5, %v900_v42 }
 0x7d8   :  { %v902_v43 = vmul.f32 %v1154_v39, %v901_v19 }
 0x7da   :  { %v906_v46 = vsel %vm905_vm13, %v1154_v39, %v902_v43 }
 0x7db   :  { %v908_v47 = vmul.f32 %v906_v46, %v884_v44 }
 0x7dd   :  { %v911_v49 = vadd.f32 %v909_v22, %v908_v47  ;;  %v1036_v22 = vperm.slane %v1464_v14, 5 }
 0x7de   :  { %v940_v48 = vpop.f32.mrf.mxu1 }
 0x7df   :  { %v941_v50 = vadd.f32 %v940_v48, %v916_v45  ;;  %1095 = vmatmul.msk.f32.gmra.mxu1 %vm50_vm0, %v911_v49 }
 0x7e1   :  { %v946_v28 = vmax.f32 %v941_v50, 0.0 }
 0x7e3   :  { %1096 = vmatmul.msk.f32.vlgmr.msra.gmra.mxu2 %vm957_vm14, %v946_v28 }
 0x85c   :  { %v943_v51 = vpop.f32.mrf.mxu1 }
 0x85d   :  { %v944_v53 = vadd.f32 %v943_v51, %v916_v45 }
 0x85f   :  { %v947_v23 = vmax.f32 %v944_v53, 0.0 }
 0x861   :  { %1097 = vmatmul.msk.f32.gmra.mxu2 %vm957_vm14, %v947_v23 }
 0x866   :  { %v981_v55 = vpop.f32.mrf.mxu2 }
 0x867   :  { %v982_v4 = vadd.f32 %v981_v55, %v956_v54 }
 0x869   :  { %v987_v56 = vadd.f32 %v982_v4, %v910_v26 }
 0x86b   :  { %v989_v57 = vsel %vm50_vm0, %v987_v56, 0.0 }
 0x86c   :  { %990 = vadd.xlane.f32.xlu2 %v989_v57 }
 0x8df   :  { %v991_v58 = vpop.xlane.xlu2 %990 }
 0x8e0   :  { %v995_v59 = vmul.f32 %v991_v58, %v1439_v52 }
 0x8e2   :  { %v997_v60 = vsub.f32 %v987_v56, %v995_v59 }
 0x8e4   :  { %v999_v6 = vmul.f32 %v997_v60, %v997_v60  ;;  %v984_v61 = vpop.f32.mrf.mxu2  ;;  %v1010_v21 = vmul.f32 %v1009_v17, %v997_v60 }
 0x8e5   :  { %v985_v62 = vadd.f32 %v984_v61, %v956_v54 }
 0x8e6   :  { %v1001_v27 = vsel %vm50_vm0, %v999_v6, 0.0 }
 0x8e7   :  { %1002 = vadd.xlane.f32.xlu0 %v1001_v27  ;;  %v988_v63 = vadd.f32 %v985_v62, %v911_v49 }
 0x8e9   :  { %v992_v5 = vsel %vm50_vm0, %v988_v63, 0.0 }
 0x8ea   :  { %993 = vadd.xlane.f32.xlu1 %v992_v5 }
 0x95a   :  { %v1003_v0 = vpop.xlane.xlu0 %1002 }
 0x95b   :  { %v1007_v1 = vmul.f32 %v1003_v0, %v1439_v52 }
 0x95d   :  { %v1012_v2 = vadd.f32 1e-05, %v1007_v1  ;;  %v994_v3 = vpop.xlane.xlu1 %993 }
 0x95e   :  { %v996_v8 = vmul.f32 %v994_v3, %v1439_v52 }
 0x95f   :  { %1155 = vrsqrt.f32 %v1012_v2  ;;  %vm1020_vm4 = vweird.f32 %v1012_v2 }
 0x960   :  { %v998_v9 = vsub.f32 %v988_v63, %v996_v8 }
 0x962   :  { %v1000_v10 = vmul.f32 %v998_v9, %v998_v9  ;;  %v1011_v37 = vmul.f32 %v1009_v17, %v998_v9 }
 0x964   :  { %v1004_v12 = vsel %vm50_vm0, %v1000_v10, 0.0 }
 0x965   :  { %v1156_v11 = vpop.eup %1155  ;;  %1005 = vadd.xlane.f32.xlu2 %v1004_v12 }
 0x966   :  { %v1015_v13 = vmul.f32 %v1156_v11, %v1012_v2  ;;  %vm1021_vm15 = vweird.f32 %v1156_v11 }
 0x967   :  { %vm1022_vm5 = vmor %vm1020_vm4, %vm1021_vm15 }
 0x968   :  { %v1016_v15 = vmul.f32 %v1156_v11, %v1015_v13 }
 0x96a   :  { %v1017_v16 = vmul.f32 0.5, %v1016_v15 }
 0x96c   :  { %v1018_v18 = vsub.f32 1.5, %v1017_v16 }
 0x96e   :  { %v1019_v20 = vmul.f32 %v1156_v11, %v1018_v18 }
 0x970   :  { %v1023_v24 = vsel %vm1022_vm5, %v1156_v11, %v1019_v20 }
 0x971   :  { %v1034_v25 = vmul.f32 %v1023_v24, %v1010_v21 }
 0x973   :  { %v1037_v26 = vadd.f32 %v1036_v22, %v1034_v25 }
 0x975   :  { %1039 = vst.msk [vmem:[#allocation5] sm:$0xff] %vm50_vm0, %v1037_v26 }
 0x9d8   :  { %v1006_v29 = vpop.xlane.xlu2 %1005 }
 0x9d9   :  { %v1008_v30 = vmul.f32 %v1006_v29, %v1439_v52 }
 0x9db   :  { %v1013_v31 = vadd.f32 1e-05, %v1008_v30 }
 0x9dd   :  { %1157 = vrsqrt.f32 %v1013_v31  ;;  %vm1030_vm7 = vweird.f32 %v1013_v31 }
 0x9e3   :  { %v1158_v32 = vpop.eup %1157 }
 0x9e4   :  { %v1025_v7 = vmul.f32 %v1158_v32, %v1013_v31  ;;  %vm1031_vm6 = vweird.f32 %v1158_v32 }
 0x9e5   :  { %vm1032_vm8 = vmor %vm1030_vm7, %vm1031_vm6 }
 0x9e6   :  { %v1026_v33 = vmul.f32 %v1158_v32, %v1025_v7 }
 0x9e8   :  { %v1027_v34 = vmul.f32 0.5, %v1026_v33 }
 0x9ea   :  { %v1028_v35 = vsub.f32 1.5, %v1027_v34 }
 0x9ec   :  { %v1029_v36 = vmul.f32 %v1158_v32, %v1028_v35 }
 0x9ee   :  { %v1033_v14 = vsel %vm1032_vm8, %v1158_v32, %v1029_v36 }
 0x9ef   :  { %v1035_v52 = vmul.f32 %v1033_v14, %v1011_v37 }
 0x9f1   :  { %v1038_v38 = vadd.f32 %v1036_v22, %v1035_v52 }
 0x9f3   :  { %1040 = vst.msk [vmem:[#allocation5 + $0x8] sm:$0xff] %vm50_vm0, %v1038_v38 }
 0x9f4   :  { %1053 = dma.vmem_to_hbm [thread:$0]  %s1046_s13, 256, %s1048_s15, [#allocation4], %s1212_s29, %s1212_s29, %s1213_s30  }
 0x9f5   :  { %1209 = dma.done.wait [#allocation4], 256  }
 0x9f6   :  { %1210 = vsyncadd [#allocation4], 4294967040 }
 0x9f7   :  { %1058 = vsyncpa [#allocation3], 1 }
 0x9f8   :  { %1059 = vsyncpa [#allocation4], 1 }

</bundles_post_ra>
